<compile_context>
chip_gen: v6e
topology: v6e:2x2x1
jax: 0.10.0
libtpu: 0.0.40
codegen_flags: <defaults>
</compile_context>

<pallas_src>
import jax
import jax.numpy as jnp
from jax import lax
from jax.experimental import pallas as pl
from jax.experimental.pallas import tpu as pltpu

BN_EPS = 1e-5
BN_SCALE = 1.0 / (1.0 + BN_EPS) ** 0.5   # eval BatchNorm1d: (x - 0) / sqrt(1 + eps)
NORM_EPS = 1e-12                          # F.normalize clamp_min eps


def _round_up(x, m):
    return ((x + m - 1) // m) * m


# ---------------------------------------------------------------------------
# Fused kernel: FM (1st + 2nd order) + deep MLP + fm_dense_linear head
# ---------------------------------------------------------------------------
def _deepfm_kernel(e1_ref, xv_ref, e2_ref, R_ref, S_ref, ST_ref,
                   w1_ref, b1_ref, w2_ref, b2_ref, w3_ref, b3_ref,
                   wd_ref, bd_ref, out_ref):
    xvals = xv_ref[...]                                               # (TN, F)

    # ---- first-order term: f1[n, f] = emb1[f, Xi[n,f]] * Xv[n, f] ----
    f1s = jnp.sum(e1_ref[...] * xvals, axis=1, keepdims=True)         # (TN, 1)

    # ---- second-order, lane-dense flat layout (TN, F*E) ----
    # broadcast Xv over the E sub-columns via constant 0/1 matrix on the MXU
    xv_b = jnp.dot(xvals, R_ref[...], preferred_element_type=jnp.float32)   # (TN, F*E)
    xv = e2_ref[...] * xv_b                                           # (TN, F*E)

    # F.normalize(xv, dim=field): per-(n, e) L2 norm over fields.
    nrm2 = jnp.dot(xv * xv, S_ref[...], preferred_element_type=jnp.float32)  # (TN, E)
    inv = lax.rsqrt(jnp.maximum(nrm2, NORM_EPS * NORM_EPS))           # 1/max(||.||, eps)
    inv_b = jnp.dot(inv, ST_ref[...], preferred_element_type=jnp.float32)    # (TN, F*E)
    xvn = xv * inv_b                                                  # (TN, F*E)

    # FM 2nd-order interaction: 0.5 * ((sum_f xvn)^2 - sum_f xvn^2), summed over E
    sum_f = jnp.dot(xvn, S_ref[...], preferred_element_type=jnp.float32)      # (TN, E)
    sum_f_sq = jnp.dot(xvn * xvn, S_ref[...], preferred_element_type=jnp.float32)
    f2 = 0.5 * (sum_f * sum_f - sum_f_sq)                             # (TN, E)
    f2s = jnp.sum(f2, axis=1, keepdims=True)                          # (TN, 1)

    # ---- deep MLP (eval-BN scale already folded into W/b; Dropout = identity) ----
    h = jnp.dot(xvn, w1_ref[...], preferred_element_type=jnp.float32) + b1_ref[...]
    h = jnp.maximum(h, 0.0)
    h = jnp.dot(h, w2_ref[...], preferred_element_type=jnp.float32) + b2_ref[...]
    h = jnp.maximum(h, 0.0)
    h = jnp.dot(h, w3_ref[...], preferred_element_type=jnp.float32) + b3_ref[...]
    h = jnp.maximum(h, 0.0)
    ds = jnp.sum(h, axis=1, keepdims=True)                            # (TN, 1)

    # ---- fm_dense_linear: [sum(f1), sum(f2), sum(deep)] @ W^T + b ----
    wd = wd_ref[...]                                                  # (3, 2) = W^T
    out_ref[...] = (f1s * wd[0:1, :] + f2s * wd[1:2, :] + ds * wd[2:3, :]
                    + bd_ref[...])                                    # (TN, 2)


def _deepfm_pallas(e1, xv, e2f, R, S, ST, Ws, bs, wd, bd, tile_n):
    Np, F = xv.shape
    D = e2f.shape[1]
    (w1, w2, w3), (b1, b2, b3) = Ws, bs

    def row_spec(c):
        return pl.BlockSpec((tile_n, c), lambda i: (i, 0))

    def pin_spec(arr):
        return pl.BlockSpec(arr.shape, lambda i: (0, 0))

    return pl.pallas_call(
        _deepfm_kernel,
        out_shape=jax.ShapeDtypeStruct((Np, 2), jnp.float32),
        grid_spec=pltpu.PrefetchScalarGridSpec(
            num_scalar_prefetch=0,
            grid=(Np // tile_n,),
            in_specs=[
                row_spec(F),            # e1   (first-order embedding values)
                row_spec(F),            # Xv
                row_spec(D),            # e2 flattened (N, F*E)
                pin_spec(R), pin_spec(S), pin_spec(ST),
                pin_spec(w1), pin_spec(b1),
                pin_spec(w2), pin_spec(b2),
                pin_spec(w3), pin_spec(b3),
                pin_spec(wd), pin_spec(bd),
            ],
            out_specs=pl.BlockSpec((tile_n, 2), lambda i: (i, 0)),
        ),
        compiler_params=pltpu.CompilerParams(
            dimension_semantics=("parallel",),      # batch tiles -> megacore on v7x
            vmem_limit_bytes=32 * 1024 * 1024,      # safe on v5e/v6e/v7x scoped VMEM
        ),
    )(e1, xv, e2f, R, S, ST, w1, b1, w2, b2, w3, b3, wd, bd)


# ---------------------------------------------------------------------------
# Parameter init (deterministic, mirrors module __init__ / init_weight)
# ---------------------------------------------------------------------------
def init_params(key, feature_sizes, embedding_size, hidden_dims):
    F = len(feature_sizes)
    E = embedding_size
    V = feature_sizes[0]
    D = F * E
    keys = jax.random.split(key, 2 + len(hidden_dims))

    # nn.Embedding default init ~ N(0, 1)
    emb1 = jax.random.normal(keys[0], (F, V, 1), jnp.float32)
    emb2 = jax.random.normal(keys[1], (F, V, E), jnp.float32)

    # hidden Linears: kaiming_normal (fan_in) weights, zero bias. Stored as (in, out).
    dims = [D] + list(hidden_dims)
    Ws, bs = [], []
    for i in range(len(hidden_dims)):
        fan_in = dims[i]
        std = (2.0 / fan_in) ** 0.5
        W = std * jax.random.normal(keys[2 + i], (dims[i], dims[i + 1]), jnp.float32)
        Ws.append(W)
        bs.append(jnp.zeros((1, dims[i + 1]), jnp.float32))

    # fm_dense_linear: weight constant 1.0 (from init_weight), bias 0
    wd = jnp.ones((3, 2), jnp.float32)               # (in=3, out=2) = W^T
    bd = jnp.zeros((1, 2), jnp.float32)
    return emb1, emb2, Ws, bs, wd, bd


def prepare_kernel_params(params):
    """Fold eval-BN scale into the MLP weights, zero-pad hidden dims to 128 lanes,
    and build the constant 0/1 layout matrices for the flat (F*E) FM reductions."""
    emb1, emb2, Ws, bs, wd, bd = params
    F, _, E = emb2.shape
    D = F * E

    Wp, bp = [], []
    in_dim = D
    for W, b in zip(Ws, bs):
        fin, fout = W.shape
        out_pad = max(128, _round_up(fout, 128))
        Wk = jnp.zeros((in_dim, out_pad), jnp.float32).at[:fin, :fout].set(W * BN_SCALE)
        bk = jnp.zeros((1, out_pad), jnp.float32).at[:, :fout].set(b * BN_SCALE)
        Wp.append(Wk)
        bp.append(bk)
        in_dim = out_pad

    # flat column j = f*E + e  (field-major, matching torch.flatten(xv, start_dim=1))
    f_of = jnp.arange(D) // E
    e_of = jnp.arange(D) % E
    R = (f_of[None, :] == jnp.arange(F)[:, None]).astype(jnp.float32)    # (F, D)
    S = (e_of[:, None] == jnp.arange(E)[None, :]).astype(jnp.float32)    # (D, E)
    ST = S.T                                                             # (E, D)
    return Wp, bp, R, S, ST, wd, bd


# ---------------------------------------------------------------------------
# Forward wrappers
# ---------------------------------------------------------------------------
def deepfm_forward(params, Xi, Xv, tile_n=None):
    emb1, emb2, Ws, bs, _, _ = params
    Wp, bp, R, S, ST, wd, bd = prepare_kernel_params(params)

    N, F, _ = Xi.shape
    E = emb2.shape[-1]
    idx = Xi[:, :, 0]                                   # (N, F)
    f_ids = jnp.arange(F)[None, :]
    # TODO(synk): for very large vocabularies, move this gather into the kernel
    # via PrefetchScalarGridSpec scalar-prefetched indices + manual DMA.
    e1 = emb1[f_ids, idx, 0]                            # (N, F)
    e2f = emb2[f_ids, idx, :].reshape(N, F * E)         # (N, F*E) lane-dense, f-major

    if tile_n is None:
        tile_n = min(512, _round_up(N, 8))              # multiple of 8 sublanes
    Np = _round_up(N, tile_n)
    if Np != N:
        pad = Np - N
        e1 = jnp.pad(e1, ((0, pad), (0, 0)))
        e2f = jnp.pad(e2f, ((0, pad), (0, 0)))
        Xv = jnp.pad(Xv, ((0, pad), (0, 0)))

    out = _deepfm_pallas(e1, Xv, e2f, R, S, ST, Wp, bp, wd, bd, tile_n)
    return out[:N]


def deepfm_reference(params, Xi, Xv):
    """Pure-JAX reference of the same (eval-mode) forward pass, unpadded params."""
    emb1, emb2, Ws, bs, wd, bd = params
    N, F, _ = Xi.shape
    idx = Xi[:, :, 0]
    f_ids = jnp.arange(F)[None, :]
    e1 = emb1[f_ids, idx, 0]
    e2 = emb2[f_ids, idx, :]

    f1 = e1 * Xv
    xv = e2 * Xv[:, :, None]
    norm = jnp.sqrt(jnp.sum(xv * xv, axis=1, keepdims=True))
    xvn = xv / jnp.maximum(norm, NORM_EPS)
    s1 = jnp.sum(xvn, axis=1) ** 2
    s2 = jnp.sum(xvn * xvn, axis=1)
    f2 = 0.5 * (s1 - s2)

    h = xvn.reshape(N, -1)
    for W, b in zip(Ws, bs):
        h = jnp.maximum((h @ W + b) * BN_SCALE, 0.0)

    final = jnp.stack([f1.sum(1), f2.sum(1), h.sum(1)], axis=1)
    return final @ wd + bd


if __name__ == "__main__":
    key = jax.random.PRNGKey(0)
    N, F, E, V = 8, 8, 8, 16                # batch, fields, embedding dim, vocab/field
    hidden_dims = [32, 32, 32]

    pkey, ikey, vkey = jax.random.split(key, 3)
    params = init_params(pkey, [V] * F, E, hidden_dims)
    Xi = jax.random.randint(ikey, (N, F, 1), 0, V, dtype=jnp.int32)
    Xv = jax.random.uniform(vkey, (N, F), dtype=jnp.float32)

    out = jax.block_until_ready(deepfm_forward(params, Xi, Xv))
    ref = deepfm_reference(params, Xi, Xv)

    assert out.shape == (N, 2)
    assert jnp.allclose(out, ref, atol=1e-3, rtol=1e-3), (out, ref)

    print("KERNEL_OK")
</pallas_src>

<mosaic_0001>
module attributes {stable_mosaic.version = 11 : i64} {
  func.func @_deepfm_kernel(%arg0: i32, %arg1: memref<8x8xf32, #tpu.memory_space<vmem>>, %arg2: memref<8x8xf32, #tpu.memory_space<vmem>>, %arg3: memref<8x64xf32, #tpu.memory_space<vmem>>, %arg4: memref<8x64xf32, #tpu.memory_space<vmem>>, %arg5: memref<64x8xf32, #tpu.memory_space<vmem>>, %arg6: memref<8x64xf32, #tpu.memory_space<vmem>>, %arg7: memref<64x128xf32, #tpu.memory_space<vmem>>, %arg8: memref<1x128xf32, #tpu.memory_space<vmem>>, %arg9: memref<128x128xf32, #tpu.memory_space<vmem>>, %arg10: memref<1x128xf32, #tpu.memory_space<vmem>>, %arg11: memref<128x128xf32, #tpu.memory_space<vmem>>, %arg12: memref<1x128xf32, #tpu.memory_space<vmem>>, %arg13: memref<3x2xf32, #tpu.memory_space<vmem>>, %arg14: memref<1x2xf32, #tpu.memory_space<vmem>>, %arg15: memref<8x2xf32, #tpu.memory_space<vmem>>) attributes {dimension_semantics = [#tpu.dimension_semantics<parallel>], iteration_bounds = array<i64: 1>, scalar_prefetch = 0 : i64, scratch_operands = 0 : i64, tpu.core_type = #tpu.core_type<tc>, window_params = [{transform_indices = @transform_0, window_bounds = array<i64: 8, 8>}, {transform_indices = @transform_1, window_bounds = array<i64: 8, 8>}, {transform_indices = @transform_2, window_bounds = array<i64: 8, 64>}, {pipeline_mode = #tpu.pipeline_mode<synchronous>, transform_indices = @transform_3, window_bounds = array<i64: 8, 64>}, {pipeline_mode = #tpu.pipeline_mode<synchronous>, transform_indices = @transform_4, window_bounds = array<i64: 64, 8>}, {pipeline_mode = #tpu.pipeline_mode<synchronous>, transform_indices = @transform_5, window_bounds = array<i64: 8, 64>}, {pipeline_mode = #tpu.pipeline_mode<synchronous>, transform_indices = @transform_6, window_bounds = array<i64: 64, 128>}, {pipeline_mode = #tpu.pipeline_mode<synchronous>, transform_indices = @transform_7, window_bounds = array<i64: 1, 128>}, {pipeline_mode = #tpu.pipeline_mode<synchronous>, transform_indices = @transform_8, window_bounds = array<i64: 128, 128>}, {pipeline_mode = #tpu.pipeline_mode<synchronous>, transform_indices = @transform_9, window_bounds = array<i64: 1, 128>}, {pipeline_mode = #tpu.pipeline_mode<synchronous>, transform_indices = @transform_10, window_bounds = array<i64: 128, 128>}, {pipeline_mode = #tpu.pipeline_mode<synchronous>, transform_indices = @transform_11, window_bounds = array<i64: 1, 128>}, {pipeline_mode = #tpu.pipeline_mode<synchronous>, transform_indices = @transform_12, window_bounds = array<i64: 3, 2>}, {pipeline_mode = #tpu.pipeline_mode<synchronous>, transform_indices = @transform_13, window_bounds = array<i64: 1, 2>}, {transform_indices = @transform_14, window_bounds = array<i64: 8, 2>}]} {
    %c0 = arith.constant 0 : index
    %c0_0 = arith.constant 0 : index
    %0 = vector.load %arg2[%c0, %c0_0] : memref<8x8xf32, #tpu.memory_space<vmem>>, vector<8x8xf32>
    %c0_1 = arith.constant 0 : index
    %c0_2 = arith.constant 0 : index
    %1 = vector.load %arg1[%c0_1, %c0_2] : memref<8x8xf32, #tpu.memory_space<vmem>>, vector<8x8xf32>
    %2 = arith.mulf %1, %0 : vector<8x8xf32>
    %cst = arith.constant dense<0.000000e+00> : vector<8xf32>
    %3 = vector.multi_reduction <add>, %2, %cst [1] : vector<8x8xf32> to vector<8xf32>
    %4 = vector.shape_cast %3 : vector<8xf32> to vector<8x1xf32>
    %c0_3 = arith.constant 0 : index
    %c0_4 = arith.constant 0 : index
    %5 = vector.load %arg4[%c0_3, %c0_4] : memref<8x64xf32, #tpu.memory_space<vmem>>, vector<8x64xf32>
    %cst_5 = arith.constant dense<0.000000e+00> : vector<8x64xf32>
    %6 = tpu.matmul %0, %5, %cst_5 {dimension_numbers = #tpu.dot_dimension_numbers<[1], [0], [0], [1], [0, 0, 1, 1], [], []>} : vector<8x8xf32>, vector<8x64xf32>, vector<8x64xf32> -> vector<8x64xf32>
    %c0_6 = arith.constant 0 : index
    %c0_7 = arith.constant 0 : index
    %7 = vector.load %arg3[%c0_6, %c0_7] : memref<8x64xf32, #tpu.memory_space<vmem>>, vector<8x64xf32>
    %8 = arith.mulf %7, %6 : vector<8x64xf32>
    %9 = arith.mulf %8, %8 : vector<8x64xf32>
    %c0_8 = arith.constant 0 : index
    %c0_9 = arith.constant 0 : index
    %10 = vector.load %arg5[%c0_8, %c0_9] : memref<64x8xf32, #tpu.memory_space<vmem>>, vector<64x8xf32>
    %cst_10 = arith.constant dense<0.000000e+00> : vector<8x8xf32>
    %11 = tpu.matmul %9, %10, %cst_10 {dimension_numbers = #tpu.dot_dimension_numbers<[1], [0], [0], [1], [0, 0, 1, 1], [], []>} : vector<8x64xf32>, vector<64x8xf32>, vector<8x8xf32> -> vector<8x8xf32>
    %cst_11 = arith.constant 1.000000e-24 : f32
    %12 = vector.broadcast %cst_11 : f32 to vector<8x8xf32>
    %13 = arith.maximumf %11, %12 : vector<8x8xf32>
    %14 = math.rsqrt %13 : vector<8x8xf32>
    %c0_12 = arith.constant 0 : index
    %c0_13 = arith.constant 0 : index
    %15 = vector.load %arg6[%c0_12, %c0_13] : memref<8x64xf32, #tpu.memory_space<vmem>>, vector<8x64xf32>
    %cst_14 = arith.constant dense<0.000000e+00> : vector<8x64xf32>
    %16 = tpu.matmul %14, %15, %cst_14 {dimension_numbers = #tpu.dot_dimension_numbers<[1], [0], [0], [1], [0, 0, 1, 1], [], []>} : vector<8x8xf32>, vector<8x64xf32>, vector<8x64xf32> -> vector<8x64xf32>
    %17 = arith.mulf %8, %16 : vector<8x64xf32>
    %c0_15 = arith.constant 0 : index
    %c0_16 = arith.constant 0 : index
    %18 = vector.load %arg5[%c0_15, %c0_16] : memref<64x8xf32, #tpu.memory_space<vmem>>, vector<64x8xf32>
    %cst_17 = arith.constant dense<0.000000e+00> : vector<8x8xf32>
    %19 = tpu.matmul %17, %18, %cst_17 {dimension_numbers = #tpu.dot_dimension_numbers<[1], [0], [0], [1], [0, 0, 1, 1], [], []>} : vector<8x64xf32>, vector<64x8xf32>, vector<8x8xf32> -> vector<8x8xf32>
    %20 = arith.mulf %17, %17 : vector<8x64xf32>
    %c0_18 = arith.constant 0 : index
    %c0_19 = arith.constant 0 : index
    %21 = vector.load %arg5[%c0_18, %c0_19] : memref<64x8xf32, #tpu.memory_space<vmem>>, vector<64x8xf32>
    %cst_20 = arith.constant dense<0.000000e+00> : vector<8x8xf32>
    %22 = tpu.matmul %20, %21, %cst_20 {dimension_numbers = #tpu.dot_dimension_numbers<[1], [0], [0], [1], [0, 0, 1, 1], [], []>} : vector<8x64xf32>, vector<64x8xf32>, vector<8x8xf32> -> vector<8x8xf32>
    %23 = arith.mulf %19, %19 : vector<8x8xf32>
    %24 = arith.subf %23, %22 : vector<8x8xf32>
    %cst_21 = arith.constant 5.000000e-01 : f32
    %25 = vector.broadcast %cst_21 : f32 to vector<8x8xf32>
    %26 = arith.mulf %25, %24 : vector<8x8xf32>
    %cst_22 = arith.constant dense<0.000000e+00> : vector<8xf32>
    %27 = vector.multi_reduction <add>, %26, %cst_22 [1] : vector<8x8xf32> to vector<8xf32>
    %28 = vector.shape_cast %27 : vector<8xf32> to vector<8x1xf32>
    %c0_23 = arith.constant 0 : index
    %c0_24 = arith.constant 0 : index
    %29 = vector.load %arg7[%c0_23, %c0_24] : memref<64x128xf32, #tpu.memory_space<vmem>>, vector<64x128xf32>
    %cst_25 = arith.constant dense<0.000000e+00> : vector<8x128xf32>
    %30 = tpu.matmul %17, %29, %cst_25 {dimension_numbers = #tpu.dot_dimension_numbers<[1], [0], [0], [1], [0, 0, 1, 1], [], []>} : vector<8x64xf32>, vector<64x128xf32>, vector<8x128xf32> -> vector<8x128xf32>
    %c0_26 = arith.constant 0 : index
    %c0_27 = arith.constant 0 : index
    %31 = vector.load %arg8[%c0_26, %c0_27] : memref<1x128xf32, #tpu.memory_space<vmem>>, vector<1x128xf32>
    %32 = vector.broadcast %31 : vector<1x128xf32> to vector<8x128xf32>
    %33 = arith.addf %30, %32 : vector<8x128xf32>
    %cst_28 = arith.constant 0.000000e+00 : f32
    %34 = vector.broadcast %cst_28 : f32 to vector<8x128xf32>
    %35 = arith.maximumf %33, %34 : vector<8x128xf32>
    %c0_29 = arith.constant 0 : index
    %c0_30 = arith.constant 0 : index
    %36 = vector.load %arg9[%c0_29, %c0_30] : memref<128x128xf32, #tpu.memory_space<vmem>>, vector<128x128xf32>
    %cst_31 = arith.constant dense<0.000000e+00> : vector<8x128xf32>
    %37 = tpu.matmul %35, %36, %cst_31 {dimension_numbers = #tpu.dot_dimension_numbers<[1], [0], [0], [1], [0, 0, 1, 1], [], []>} : vector<8x128xf32>, vector<128x128xf32>, vector<8x128xf32> -> vector<8x128xf32>
    %c0_32 = arith.constant 0 : index
    %c0_33 = arith.constant 0 : index
    %38 = vector.load %arg10[%c0_32, %c0_33] : memref<1x128xf32, #tpu.memory_space<vmem>>, vector<1x128xf32>
    %39 = vector.broadcast %38 : vector<1x128xf32> to vector<8x128xf32>
    %40 = arith.addf %37, %39 : vector<8x128xf32>
    %cst_34 = arith.constant 0.000000e+00 : f32
    %41 = vector.broadcast %cst_34 : f32 to vector<8x128xf32>
    %42 = arith.maximumf %40, %41 : vector<8x128xf32>
    %c0_35 = arith.constant 0 : index
    %c0_36 = arith.constant 0 : index
    %43 = vector.load %arg11[%c0_35, %c0_36] : memref<128x128xf32, #tpu.memory_space<vmem>>, vector<128x128xf32>
    %cst_37 = arith.constant dense<0.000000e+00> : vector<8x128xf32>
    %44 = tpu.matmul %42, %43, %cst_37 {dimension_numbers = #tpu.dot_dimension_numbers<[1], [0], [0], [1], [0, 0, 1, 1], [], []>} : vector<8x128xf32>, vector<128x128xf32>, vector<8x128xf32> -> vector<8x128xf32>
    %c0_38 = arith.constant 0 : index
    %c0_39 = arith.constant 0 : index
    %45 = vector.load %arg12[%c0_38, %c0_39] : memref<1x128xf32, #tpu.memory_space<vmem>>, vector<1x128xf32>
    %46 = vector.broadcast %45 : vector<1x128xf32> to vector<8x128xf32>
    %47 = arith.addf %44, %46 : vector<8x128xf32>
    %cst_40 = arith.constant 0.000000e+00 : f32
    %48 = vector.broadcast %cst_40 : f32 to vector<8x128xf32>
    %49 = arith.maximumf %47, %48 : vector<8x128xf32>
    %cst_41 = arith.constant dense<0.000000e+00> : vector<8xf32>
    %50 = vector.multi_reduction <add>, %49, %cst_41 [1] : vector<8x128xf32> to vector<8xf32>
    %51 = vector.shape_cast %50 : vector<8xf32> to vector<8x1xf32>
    %c0_42 = arith.constant 0 : index
    %c0_43 = arith.constant 0 : index
    %52 = vector.load %arg13[%c0_42, %c0_43] : memref<3x2xf32, #tpu.memory_space<vmem>>, vector<3x2xf32>
    %53 = vector.extract_strided_slice %52 {offsets = [0, 0], sizes = [1, 2], strides = [1, 1]} : vector<3x2xf32> to vector<1x2xf32>
    %54 = vector.broadcast %4 : vector<8x1xf32> to vector<8x2xf32>
    %55 = vector.broadcast %53 : vector<1x2xf32> to vector<8x2xf32>
    %56 = arith.mulf %54, %55 : vector<8x2xf32>
    %57 = vector.extract_strided_slice %52 {offsets = [1, 0], sizes = [1, 2], strides = [1, 1]} : vector<3x2xf32> to vector<1x2xf32>
    %58 = vector.broadcast %28 : vector<8x1xf32> to vector<8x2xf32>
    %59 = vector.broadcast %57 : vector<1x2xf32> to vector<8x2xf32>
    %60 = arith.mulf %58, %59 : vector<8x2xf32>
    %61 = arith.addf %56, %60 : vector<8x2xf32>
    %62 = vector.extract_strided_slice %52 {offsets = [2, 0], sizes = [1, 2], strides = [1, 1]} : vector<3x2xf32> to vector<1x2xf32>
    %63 = vector.broadcast %51 : vector<8x1xf32> to vector<8x2xf32>
    %64 = vector.broadcast %62 : vector<1x2xf32> to vector<8x2xf32>
    %65 = arith.mulf %63, %64 : vector<8x2xf32>
    %66 = arith.addf %61, %65 : vector<8x2xf32>
    %c0_44 = arith.constant 0 : index
    %c0_45 = arith.constant 0 : index
    %67 = vector.load %arg14[%c0_44, %c0_45] : memref<1x2xf32, #tpu.memory_space<vmem>>, vector<1x2xf32>
    %68 = vector.broadcast %67 : vector<1x2xf32> to vector<8x2xf32>
    %69 = arith.addf %66, %68 : vector<8x2xf32>
    %c0_46 = arith.constant 0 : index
    %c0_47 = arith.constant 0 : index
    %70 = vector.load %arg15[%c0_46, %c0_47] : memref<8x2xf32, #tpu.memory_space<vmem>>, vector<8x2xf32>
    tpu.vector_store %arg15[%c0_46, %c0_47], %69 {strides = array<i32>} : memref<8x2xf32, #tpu.memory_space<vmem>>, vector<8x2xf32>,
    return
  }
  func.func @transform_0(%arg0: i32) -> (i32, i32) {
    %c0_i32 = arith.constant 0 : i32
    %c0_i32_0 = arith.constant 0 : i32
    return %arg0, %c0_i32 : i32, i32
  }
  func.func @transform_1(%arg0: i32) -> (i32, i32) {
    %c0_i32 = arith.constant 0 : i32
    %c0_i32_0 = arith.constant 0 : i32
    return %arg0, %c0_i32 : i32, i32
  }
  func.func @transform_2(%arg0: i32) -> (i32, i32) {
    %c0_i32 = arith.constant 0 : i32
    %c0_i32_0 = arith.constant 0 : i32
    return %arg0, %c0_i32 : i32, i32
  }
  func.func @transform_3(%arg0: i32) -> (i32, i32) {
    %c0_i32 = arith.constant 0 : i32
    %c0_i32_0 = arith.constant 0 : i32
    %c0_i32_1 = arith.constant 0 : i32
    return %c0_i32, %c0_i32_0 : i32, i32
  }
  func.func @transform_4(%arg0: i32) -> (i32, i32) {
    %c0_i32 = arith.constant 0 : i32
    %c0_i32_0 = arith.constant 0 : i32
    %c0_i32_1 = arith.constant 0 : i32
    return %c0_i32, %c0_i32_0 : i32, i32
  }
  func.func @transform_5(%arg0: i32) -> (i32, i32) {
    %c0_i32 = arith.constant 0 : i32
    %c0_i32_0 = arith.constant 0 : i32
    %c0_i32_1 = arith.constant 0 : i32
    return %c0_i32, %c0_i32_0 : i32, i32
  }
  func.func @transform_6(%arg0: i32) -> (i32, i32) {
    %c0_i32 = arith.constant 0 : i32
    %c0_i32_0 = arith.constant 0 : i32
    %c0_i32_1 = arith.constant 0 : i32
    return %c0_i32, %c0_i32_0 : i32, i32
  }
  func.func @transform_7(%arg0: i32) -> (i32, i32) {
    %c0_i32 = arith.constant 0 : i32
    %c0_i32_0 = arith.constant 0 : i32
    %c0_i32_1 = arith.constant 0 : i32
    return %c0_i32, %c0_i32_0 : i32, i32
  }
  func.func @transform_8(%arg0: i32) -> (i32, i32) {
    %c0_i32 = arith.constant 0 : i32
    %c0_i32_0 = arith.constant 0 : i32
    %c0_i32_1 = arith.constant 0 : i32
    return %c0_i32, %c0_i32_0 : i32, i32
  }
  func.func @transform_9(%arg0: i32) -> (i32, i32) {
    %c0_i32 = arith.constant 0 : i32
    %c0_i32_0 = arith.constant 0 : i32
    %c0_i32_1 = arith.constant 0 : i32
    return %c0_i32, %c0_i32_0 : i32, i32
  }
  func.func @transform_10(%arg0: i32) -> (i32, i32) {
    %c0_i32 = arith.constant 0 : i32
    %c0_i32_0 = arith.constant 0 : i32
    %c0_i32_1 = arith.constant 0 : i32
    return %c0_i32, %c0_i32_0 : i32, i32
  }
  func.func @transform_11(%arg0: i32) -> (i32, i32) {
    %c0_i32 = arith.constant 0 : i32
    %c0_i32_0 = arith.constant 0 : i32
    %c0_i32_1 = arith.constant 0 : i32
    return %c0_i32, %c0_i32_0 : i32, i32
  }
  func.func @transform_12(%arg0: i32) -> (i32, i32) {
    %c0_i32 = arith.constant 0 : i32
    %c0_i32_0 = arith.constant 0 : i32
    %c0_i32_1 = arith.constant 0 : i32
    return %c0_i32, %c0_i32_0 : i32, i32
  }
  func.func @transform_13(%arg0: i32) -> (i32, i32) {
    %c0_i32 = arith.constant 0 : i32
    %c0_i32_0 = arith.constant 0 : i32
    %c0_i32_1 = arith.constant 0 : i32
    return %c0_i32, %c0_i32_0 : i32, i32
  }
  func.func @transform_14(%arg0: i32) -> (i32, i32) {
    %c0_i32 = arith.constant 0 : i32
    %c0_i32_0 = arith.constant 0 : i32
    return %arg0, %c0_i32 : i32, i32
  }
}

</mosaic_0001>

<bundles_post_ra>
// kernel: tpu_custom_call.1
= control target key start
LH: loop header
LB: loop body
LE: loop exit
PB: predicated region body
PF: predicated region fallthrough
CT: control target
= control target key end

     0   :  { %19 = vsyncpa [#allocation3], 0  ;;  %s1444_s0 = inlined_call_operand.vmem [shape: f32[8,8], index: 0, kind: input, shape index: {}]   ;;  %s1445_s1 = inlined_call_operand.vmem [shape: f32[8,8], index: 1, kind: input, shape index: {}]   ;;  %s1446_s2 = inlined_call_operand.vmem [shape: f32[8,64], index: 2, kind: input, shape index: {}]   ;;  %s1447_s3 = inlined_call_operand.hbm [shape: f32[8,64], index: 3, kind: input, shape index: {}]   ;;  %s1448_s4 = inlined_call_operand.vmem [shape: f32[64,8], index: 4, kind: input, shape index: {}]   ;;  %s1449_s5 = inlined_call_operand.hbm [shape: f32[8,64], index: 5, kind: input, shape index: {}]   ;;  %s1450_s6 = inlined_call_operand.vmem [shape: f32[64,128], index: 6, kind: input, shape index: {}]   ;;  %s1451_s7 = inlined_call_operand.hbm [shape: f32[1,128], index: 7, kind: input, shape index: {}]   ;;  %s1452_s8 = inlined_call_operand.hbm [shape: f32[128,128], index: 8, kind: input, shape index: {}]   ;;  %s1453_s9 = inlined_call_operand.vmem [shape: f32[1,128], index: 9, kind: input, shape index: {}]   ;;  %s1454_s10 = inlined_call_operand.hbm [shape: f32[128,128], index: 10, kind: input, shape index: {}]   ;;  %s1455_s11 = inlined_call_operand.vmem [shape: f32[1,128], index: 11, kind: input, shape index: {}]   ;;  %s1456_s12 = inlined_call_operand.vmem [shape: f32[3,2], index: 12, kind: input, shape index: {}]   ;;  %s1457_s13 = inlined_call_operand.vmem [shape: f32[1,2], index: 13, kind: input, shape index: {}]   ;;  %s1458_s14 = inlined_call_operand.vmem [shape: f32[8,2], index: 14, kind: output, shape index: {}]  }
   0x1   :  { %20 = vsyncpa [#allocation5], 0 }
   0x2   :  { %21 = vsyncpa [#allocation8], 0  ;;  %s1173_s29 = smov [#allocation4]   ;;  %s1174_s15 = smov [#allocation7]  }
   0x3   :  { %s46_s30 = sshll.u32 %s1173_s29, 4  ;;  %s67_s16 = sshll.u32 %s1174_s15, 4  ;;  %s47_s30 = int_to_ptr.vmem [resolvable:$true] %s46_s30  ;;  %s68_s16 = int_to_ptr.vmem [resolvable:$true] %s67_s16 }
   0x4   :  { %s1075_s17 = scalar_lea.vmem %s47_s30, 128  ;;  %p1080_p1 = scmp.lt.s32.totalorder %s47_s30, %s47_s30 }
   0x5   :  { %p1076_p0 = scmp.ne.s32.totalorder %s47_s30, %s1075_s17  ;;  %p1081_p2 = scmp.lt.s32.totalorder %s1075_s17, %s1075_s17 }
   0x7   :  { %p1082_p3 = por %p1081_p2, %p1080_p1 }
   0x9   :  { %p1083_p4 = pnand %p1082_p3, %p1076_p0 }
   0xb   :  { %1086 = shalt.err (!%p1083_p4)
}
   0xc   :  { %49 = dma.hbm_to_vmem [thread:$0]  %s1449_s5, 128, %s47_s30, [#allocation5]  }
   0xd   :  { %s1095_s20 = scalar_lea.vmem %s68_s16, 2048  ;;  %p1100_p6 = scmp.lt.s32.totalorder %s68_s16, %s68_s16 }
   0xe   :  { %p1096_p5 = scmp.ne.s32.totalorder %s68_s16, %s1095_s20  ;;  %p1101_p7 = scmp.lt.s32.totalorder %s1095_s20, %s1095_s20 }
  0x10   :  { %p1102_p8 = por %p1101_p7, %p1100_p6 }
  0x12   :  { %p1103_p9 = pnand %p1102_p8, %p1096_p5 }
  0x14   :  { %1106 = shalt.err (!%p1103_p9)
}
  0x15   :  { %s1175_s21 = smov 128   ;;  %s1176_s22 = smov 8  }
  0x16   :  { %73 = dma.hbm_to_vmem [thread:$0]  %s1452_s8, 2048, %s68_s16, [#allocation8], %s1175_s21, %s1175_s21, %s1176_s22  }
  0x17   :  { %s1177_s25 = smov [#allocation2]   ;;  %s1178_s27 = smov [#allocation6]  }
  0x18   :  { %s34_s26 = sshll.u32 %s1177_s25, 4  ;;  %s58_s5 = sshll.u32 %s1178_s27, 4  ;;  %s35_s26 = int_to_ptr.vmem [resolvable:$true] %s34_s26  ;;  %s59_s5 = int_to_ptr.vmem [resolvable:$true] %s58_s5 }
  0x19   :  { %s1115_s28 = scalar_lea.vmem %s35_s26, 128  ;;  %p1120_p11 = scmp.lt.s32.totalorder %s35_s26, %s35_s26 }
  0x1a   :  { %p1116_p10 = scmp.ne.s32.totalorder %s35_s26, %s1115_s28  ;;  %p1121_p12 = scmp.lt.s32.totalorder %s1115_s28, %s1115_s28 }
  0x1c   :  { %p1122_p13 = por %p1121_p12, %p1120_p11 }
  0x1e   :  { %p1123_p0 = pnand %p1122_p13, %p1116_p10 }
  0x20   :  { %1126 = shalt.err (!%p1123_p0)
}
  0x21   :  { %37 = dma.hbm_to_vmem [thread:$0]  %s1447_s3, 128, %s35_s26, [#allocation3]  }
  0x22   :  { %s1135_s15 = scalar_lea.vmem %s59_s5, 16  ;;  %s1139_s8 = scalar_lea.vmem %s59_s5, 32 }
  0x23   :  { %p1136_p1 = scmp.ne.s32.totalorder %s59_s5, %s1135_s15  ;;  %p1140_p2 = scmp.lt.s32.totalorder %s59_s5, %s59_s5 }
  0x24   :  { %p1141_p3 = scmp.lt.s32.totalorder %s1139_s8, %s1135_s15 }
  0x26   :  { %p1142_p4 = por %p1141_p3, %p1140_p2 }
  0x28   :  { %p1143_p5 = pnand %p1142_p4, %p1136_p1 }
  0x2a   :  { %1146 = shalt.err (!%p1143_p5)
}
  0x2b   :  { %61 = dma.hbm_to_vmem [thread:$0]  %s1451_s7, 16, %s59_s5, [#allocation5]  }
  0x2c   :  { %s1179_s18 = smov [#allocation9]  }
  0x2d   :  { %s81_s19 = sshll.u32 %s1179_s18, 4  ;;  %s82_s19 = int_to_ptr.vmem [resolvable:$true] %s81_s19 }
  0x2e   :  { %s1155_s20 = scalar_lea.vmem %s82_s19, 2048  ;;  %p1160_p7 = scmp.lt.s32.totalorder %s82_s19, %s82_s19 }
  0x2f   :  { %p1156_p6 = scmp.ne.s32.totalorder %s82_s19, %s1155_s20  ;;  %p1161_p8 = scmp.lt.s32.totalorder %s1155_s20, %s1155_s20 }
  0x31   :  { %p1162_p9 = por %p1161_p8, %p1160_p7 }
  0x33   :  { %p1163_p10 = pnand %p1162_p9, %p1156_p6 }
  0x35   :  { %1166 = shalt.err (!%p1163_p10)
}
  0x36   :  { %87 = dma.hbm_to_vmem [thread:$0]  %s1454_s10, 2048, %s82_s19, [#allocation8], %s1175_s21, %s1175_s21, %s1176_s22  }
  0x37   :  { %1167 = dma.done.wait [#allocation3], 128  }
  0x38   :  { %1168 = vsyncadd [#allocation3], 4294967168 }
  0x39   :  { %1169 = dma.done.wait [#allocation5], 144  }
  0x3a   :  { %1170 = vsyncadd [#allocation5], 4294967152 }
  0x3b   :  { %1171 = dma.done.wait [#allocation8], 4096  }
  0x3c   :  { %1172 = vsyncadd [#allocation8], 4294963200  ;;  %v1180_v0 = vmov 0.0   ;;  %vm1181_vm0 = vmmov 0   ;;  %vm112_vm1 = vcmask 64512   ;;  %v116_v1 = vld [vmem:[#allocation2] sm:$0xff] }
  0x3d   :  { %900 = vmatprep.subr.mxu1 %v1180_v0  ;;  %902 = vmatprep.mubr.msk.f32.mxu1 %vm1181_vm0, %v1180_v0  ;;  %v1287_v2 = vld [vmem:[%s1445_s1] sm:$0xff]  ;;  %v200_v3 = vld [vmem:[%s1448_s4 + $0x38] sm:$0xff]  ;;  %v199_v4 = vld [vmem:[%s1448_s4 + $0x30] sm:$0xff]  ;;  %vm201_vm2 = vcmask 523264   ;;  %vm807_vm3 = vcmask 15360  }
  0x3e   :  { %924 = vmatprep.subr.mxu0 %v1180_v0  ;;  %926 = vmatprep.mubr.msk.f32.mxu0 %vm1181_vm0, %v1180_v0  ;;  %v198_v5 = vld [vmem:[%s1448_s4 + $0x28] sm:$0xff]  ;;  %v197_v6 = vld [vmem:[%s1448_s4 + $0x20] sm:$0xff]  ;;  %v196_v7 = vld [vmem:[%s1448_s4 + $0x18] sm:$0xff] }
  0x3f   :  { %901 = vmatpush3.msra.mxu1 %v116_v1  ;;  %v195_v8 = vld [vmem:[%s1448_s4 + $0x10] sm:$0xff]  ;;  %v194_v9 = vld [vmem:[%s1448_s4 + $0x8] sm:$0xff]  ;;  %v193_v10 = vld [vmem:[%s1448_s4] sm:$0xff] }
  0x40   :  { %903 = vmatmul.mubr.msk.f32.vlgmr.msra.gmra.mxu1 %vm112_vm1, %v1287_v2  ;;  %905 = vmatprep.subr.mxu1 %v1180_v0  ;;  %v190_v11 = vld [vmem:[%s1446_s2] sm:$0xff]  ;;  %v277_v16 = vld [vmem:[#allocation4] sm:$0xff]  ;;  %v512_v23 = vld [vmem:[%s1450_s6 + $0x38] sm:$0xff] }
  0x41   :  { %906 = vmatpush3.msra.mxu1 %v200_v3  ;;  %921 = vmatprep.mubr.msk.f32.mxu1 %vm1181_vm0, %v1180_v0  ;;  %v511_v26 = vld [vmem:[%s1450_s6 + $0x30] sm:$0xff]  ;;  %v510_v28 = vld [vmem:[%s1450_s6 + $0x28] sm:$0xff]  ;;  %v509_v30 = vld [vmem:[%s1450_s6 + $0x20] sm:$0xff] }
  0x42   :  { %907 = vmatprep.subr.mxu1 %v1180_v0  ;;  %925 = vmatpush3.msra.mxu0 %v277_v16  ;;  %v606_v27 = vld [vmem:[#allocation7 + $0x78] sm:$0xff]  ;;  %v605_v29 = vld [vmem:[#allocation7 + $0x70] sm:$0xff]  ;;  %v604_v31 = vld [vmem:[#allocation7 + $0x68] sm:$0xff] }
  0x43   :  { %908 = vmatpush3.msra.mxu1 %v199_v4  ;;  %929 = vmatprep.subr.mxu0 %v1180_v0  ;;  %v508_v32 = vld [vmem:[%s1450_s6 + $0x18] sm:$0xff]  ;;  %v507_v34 = vld [vmem:[%s1450_s6 + $0x10] sm:$0xff]  ;;  %v506_v36 = vld [vmem:[%s1450_s6 + $0x8] sm:$0xff] }
  0x44   :  { %909 = vmatprep.subr.mxu1 %v1180_v0  ;;  %v603_v33 = vld [vmem:[#allocation7 + $0x60] sm:$0xff]  ;;  %v602_v35 = vld [vmem:[#allocation7 + $0x58] sm:$0xff]  ;;  %v601_v37 = vld [vmem:[#allocation7 + $0x50] sm:$0xff] }
  0x45   :  { %910 = vmatpush3.msra.mxu1 %v198_v5  ;;  %v505_v38 = vld [vmem:[%s1450_s6] sm:$0xff]  ;;  %v599_v42 = vld [vmem:[#allocation7 + $0x40] sm:$0xff]  ;;  %v598_v44 = vld [vmem:[#allocation7 + $0x38] sm:$0xff] }
  0x46   :  { %911 = vmatprep.subr.mxu1 %v1180_v0  ;;  %v600_v39 = vld [vmem:[#allocation7 + $0x48] sm:$0xff]  ;;  %v597_v45 = vld [vmem:[#allocation7 + $0x30] sm:$0xff]  ;;  %v595_v47 = vld [vmem:[#allocation7 + $0x20] sm:$0xff] }
  0x47   :  { %912 = vmatpush3.msra.mxu1 %v197_v6  ;;  %v110_v40 = vld [vmem:[%s1444_s0] sm:$0xff]  ;;  %v594_v48 = vld [vmem:[#allocation7 + $0x18] sm:$0xff]  ;;  %v591_v51 = vld [vmem:[#allocation7] sm:$0xff] }
  0x48   :  { %913 = vmatprep.subr.mxu1 %v1180_v0  ;;  %v111_v41 = vmul.f32 %v110_v40, %v1287_v2  ;;  %v596_v46 = vld [vmem:[#allocation7 + $0x28] sm:$0xff]  ;;  %v593_v49 = vld [vmem:[#allocation7 + $0x10] sm:$0xff]  ;;  %v821_v60 = vld [vmem:[#allocation6] ss:$0 sm:$0xff] }
  0x49   :  { %914 = vmatpush3.msra.mxu1 %v196_v7  ;;  %v592_v50 = vld [vmem:[#allocation7 + $0x8] sm:$0xff]  ;;  %v700_v2 = vld [vmem:[#allocation9 + $0x78] sm:$0xff] }
  0x4a   :  { %915 = vmatprep.subr.mxu1 %v1180_v0  ;;  %v113_v43 = vsel %vm112_vm1, %v111_v41, 0.0  ;;  %v686_v16 = vld [vmem:[#allocation9 + $0x8] sm:$0xff] }
  0x4b   :  { %916 = vmatpush3.msra.mxu1 %v195_v8  ;;  %114 = vadd.xlane.f32.xlu0 %v113_v43  ;;  %v825_v43 = vld [vmem:[%s1457_s13] ss:$0 sm:$0xff] }
  0x4c   :  { %917 = vmatprep.subr.mxu1 %v1180_v0 }
  0x4d   :  { %918 = vmatpush3.msra.mxu1 %v194_v9 }
  0x4e   :  { %919 = vmatprep.subr.mxu1 %v1180_v0 }
  0x4f   :  { %920 = vmatpush3.msra.mxu1 %v193_v10 }
  0x50   :  { %948 = vmatprep.subr.mxu1 %v1180_v0 }
 0x100   :  { %v186_v12 = vpop.f32.mrf.mxu1 }
 0x101   :  { %v191_v13 = vmul.f32 %v190_v11, %v186_v12  ;;  %v691_v11 = vld [vmem:[#allocation9 + $0x30] sm:$0xff]  ;;  %v690_v12 = vld [vmem:[#allocation9 + $0x28] sm:$0xff] }
 0x102   :  { %v904_v14 = vpop.f32.mrf.mxu1 }
 0x103   :  { %v192_v15 = vmul.f32 %v191_v13, %v191_v13  ;;  %v688_v14 = vld [vmem:[#allocation9 + $0x18] sm:$0xff] }
 0x105   :  { %922 = vmatmul.mubr.msk.f32.vlgmr.msra.gmra.mxu1 %vm201_vm2, %v192_v15  ;;  %v687_v15 = vld [vmem:[#allocation9 + $0x10] sm:$0xff] }
 0x106   :  { %949 = vmatpush3.msra.mxu1 %v200_v3  ;;  %964 = vmatprep.mubr.msk.f32.mxu1 %vm1181_vm0, %v1180_v0 }
 0x107   :  { %950 = vmatprep.subr.mxu1 %v1180_v0 }
 0x108   :  { %951 = vmatpush3.msra.mxu1 %v199_v4 }
 0x109   :  { %952 = vmatprep.subr.mxu1 %v1180_v0 }
 0x10a   :  { %953 = vmatpush3.msra.mxu1 %v198_v5 }
 0x10b   :  { %954 = vmatprep.subr.mxu1 %v1180_v0 }
 0x10c   :  { %955 = vmatpush3.msra.mxu1 %v197_v6 }
 0x10d   :  { %956 = vmatprep.subr.mxu1 %v1180_v0 }
 0x10e   :  { %957 = vmatpush3.msra.mxu1 %v196_v7 }
 0x10f   :  { %958 = vmatprep.subr.mxu1 %v1180_v0 }
 0x110   :  { %959 = vmatpush3.msra.mxu1 %v195_v8 }
 0x111   :  { %960 = vmatprep.subr.mxu1 %v1180_v0 }
 0x112   :  { %961 = vmatpush3.msra.mxu1 %v194_v9 }
 0x113   :  { %962 = vmatprep.subr.mxu1 %v1180_v0 }
 0x114   :  { %963 = vmatpush3.msra.mxu1 %v193_v10 }
 0x115   :  { %986 = vmatprep.subr.mxu1 %v1180_v0 }
 0x1c5   :  { %v271_v17 = vpop.f32.mrf.mxu1 }
 0x1c6   :  { %v275_v18 = vmax.f32 %v271_v17, 1e-24  ;;  %v685_v17 = vld [vmem:[#allocation9] sm:$0xff] }
 0x1c7   :  { %v923_v19 = vpop.f32.mrf.mxu1 }
 0x1c8   :  { %1065 = vrsqrt.f32 %v275_v18  ;;  %v823_v18 = vld [vmem:[%s1453_s9] ss:$0 sm:$0xff] }
 0x1d5   :  { %v1066_v20 = vpop.eup %1065 }
 0x1d6   :  { %927 = vmatmul.mubr.msk.f32.vlgmr.msra.gmra.mxu0 %vm112_vm1, %v1066_v20 }
 0x1d7   :  { %930 = vmatpush3.msra.mxu0 %v200_v3  ;;  %945 = vmatprep.mubr.msk.f32.mxu0 %vm1181_vm0, %v1180_v0  ;;  %v699_v3 = vld [vmem:[#allocation9 + $0x70] sm:$0xff] }
 0x1d8   :  { %931 = vmatprep.subr.mxu0 %v1180_v0 }
 0x1d9   :  { %932 = vmatpush3.msra.mxu0 %v199_v4  ;;  %v698_v4 = vld [vmem:[#allocation9 + $0x68] sm:$0xff] }
 0x1da   :  { %933 = vmatprep.subr.mxu0 %v1180_v0 }
 0x1db   :  { %934 = vmatpush3.msra.mxu0 %v198_v5  ;;  %v697_v5 = vld [vmem:[#allocation9 + $0x60] sm:$0xff] }
 0x1dc   :  { %935 = vmatprep.subr.mxu0 %v1180_v0 }
 0x1dd   :  { %936 = vmatpush3.msra.mxu0 %v197_v6  ;;  %v696_v6 = vld [vmem:[#allocation9 + $0x58] sm:$0xff] }
 0x1de   :  { %937 = vmatprep.subr.mxu0 %v1180_v0 }
 0x1df   :  { %938 = vmatpush3.msra.mxu0 %v196_v7  ;;  %v695_v7 = vld [vmem:[#allocation9 + $0x50] sm:$0xff] }
 0x1e0   :  { %939 = vmatprep.subr.mxu0 %v1180_v0 }
 0x1e1   :  { %940 = vmatpush3.msra.mxu0 %v195_v8  ;;  %v694_v8 = vld [vmem:[#allocation9 + $0x48] sm:$0xff] }
 0x1e2   :  { %941 = vmatprep.subr.mxu0 %v1180_v0 }
 0x1e3   :  { %942 = vmatpush3.msra.mxu0 %v194_v9  ;;  %v693_v9 = vld [vmem:[#allocation9 + $0x40] sm:$0xff] }
 0x1e4   :  { %943 = vmatprep.subr.mxu0 %v1180_v0 }
 0x1e5   :  { %944 = vmatpush3.msra.mxu0 %v193_v10  ;;  %v692_v10 = vld [vmem:[#allocation9 + $0x38] sm:$0xff] }
 0x1e6   :  { %967 = vmatprep.subr.mxu0 %v1180_v0 }
 0x296   :  { %v347_v21 = vpop.f32.mrf.mxu0 }
 0x297   :  { %v351_v22 = vmul.f32 %v347_v21, %v191_v13  ;;  %v689_v13 = vld [vmem:[#allocation9 + $0x20] sm:$0xff] }
 0x298   :  { %v928_v24 = vpop.f32.mrf.mxu0 }
 0x299   :  { %v425_v25 = vmul.f32 %v351_v22, %v351_v22  ;;  %946 = vmatmul.mubr.msk.f32.vlgmr.msra.gmra.mxu0 %vm201_vm2, %v351_v22 }
 0x29a   :  { %968 = vmatpush3.msra.mxu0 %v512_v23  ;;  %983 = vmatprep.mubr.msk.f32.mxu0 %vm1181_vm0, %v1180_v0  ;;  %v824_v23 = vld [vmem:[%s1455_s11] ss:$0 sm:$0xff] }
 0x29b   :  { %969 = vmatprep.subr.mxu0 %v1180_v0  ;;  %965 = vmatmul.mubr.msk.f32.vlgmr.msra.gmra.mxu1 %vm201_vm2, %v425_v25 }
 0x29c   :  { %970 = vmatpush3.msra.mxu0 %v511_v26  ;;  %987 = vmatpush3.msra.mxu1 %v606_v27 }
 0x29d   :  { %971 = vmatprep.subr.mxu0 %v1180_v0  ;;  %988 = vmatprep.subr.mxu1 %v1180_v0 }
 0x29e   :  { %972 = vmatpush3.msra.mxu0 %v510_v28  ;;  %989 = vmatpush3.msra.mxu1 %v605_v29  ;;  %v115_v29 = vpop.xlane.xlu0 %114 }
 0x29f   :  { %973 = vmatprep.subr.mxu0 %v1180_v0  ;;  %990 = vmatprep.subr.mxu1 %v1180_v0 }
 0x2a0   :  { %974 = vmatpush3.msra.mxu0 %v509_v30  ;;  %991 = vmatpush3.msra.mxu1 %v604_v31 }
 0x2a1   :  { %975 = vmatprep.subr.mxu0 %v1180_v0  ;;  %992 = vmatprep.subr.mxu1 %v1180_v0 }
 0x2a2   :  { %976 = vmatpush3.msra.mxu0 %v508_v32  ;;  %993 = vmatpush3.msra.mxu1 %v603_v33  ;;  %v781_v32 = vld [vmem:[%s1456_s12] sm:$0x7] }
 0x2a3   :  { %977 = vmatprep.subr.mxu0 %v1180_v0  ;;  %994 = vmatprep.subr.mxu1 %v1180_v0 }
 0x2a4   :  { %978 = vmatpush3.msra.mxu0 %v507_v34  ;;  %995 = vmatpush3.msra.mxu1 %v602_v35 }
 0x2a5   :  { %979 = vmatprep.subr.mxu0 %v1180_v0  ;;  %996 = vmatprep.subr.mxu1 %v1180_v0 }
 0x2a6   :  { %980 = vmatpush3.msra.mxu0 %v506_v36  ;;  %997 = vmatpush3.msra.mxu1 %v601_v37 }
 0x2a7   :  { %981 = vmatprep.subr.mxu0 %v1180_v0  ;;  %998 = vmatprep.subr.mxu1 %v1180_v0 }
 0x2a8   :  { %982 = vmatpush3.msra.mxu0 %v505_v38  ;;  %1018 = vmatprep.mubr.msk.f32.mxu1 %vm1181_vm0, %v1180_v0 }
 0x2a9   :  { %984 = vmatmul.mubr.msk.f32.vlgmr.msra.gmra.mxu0 %vm201_vm2, %v351_v22  ;;  %1021 = vmatprep.subr.mxu0 %v1180_v0 }
 0x2aa   :  { %1053 = vmatprep.mubr.msk.f32.mxu0 %vm1181_vm0, %v1180_v0  ;;  %999 = vmatpush3.msra.mxu1 %v600_v39 }
 0x2ab   :  { %1000 = vmatprep.subr.mxu1 %v1180_v0  ;;  %1022 = vmatpush3.msra.mxu0 %v700_v2 }
 0x2ac   :  { %1001 = vmatpush3.msra.mxu1 %v599_v42  ;;  %1023 = vmatprep.subr.mxu0 %v1180_v0 }
 0x2ad   :  { %1002 = vmatprep.subr.mxu1 %v1180_v0  ;;  %1024 = vmatpush3.msra.mxu0 %v699_v3 }
 0x2ae   :  { %1003 = vmatpush3.msra.mxu1 %v598_v44  ;;  %1025 = vmatprep.subr.mxu0 %v1180_v0 }
 0x2af   :  { %1004 = vmatprep.subr.mxu1 %v1180_v0  ;;  %1026 = vmatpush3.msra.mxu0 %v698_v4 }
 0x2b0   :  { %1005 = vmatpush3.msra.mxu1 %v597_v45  ;;  %1027 = vmatprep.subr.mxu0 %v1180_v0 }
 0x2b1   :  { %1006 = vmatprep.subr.mxu1 %v1180_v0  ;;  %1028 = vmatpush3.msra.mxu0 %v697_v5 }
 0x2b2   :  { %1007 = vmatpush3.msra.mxu1 %v596_v46  ;;  %1029 = vmatprep.subr.mxu0 %v1180_v0 }
 0x2b3   :  { %1008 = vmatprep.subr.mxu1 %v1180_v0  ;;  %1030 = vmatpush3.msra.mxu0 %v696_v6 }
 0x2b4   :  { %1009 = vmatpush3.msra.mxu1 %v595_v47  ;;  %1031 = vmatprep.subr.mxu0 %v1180_v0 }
 0x2b5   :  { %1010 = vmatprep.subr.mxu1 %v1180_v0  ;;  %1032 = vmatpush3.msra.mxu0 %v695_v7 }
 0x2b6   :  { %1011 = vmatpush3.msra.mxu1 %v594_v48  ;;  %1033 = vmatprep.subr.mxu0 %v1180_v0 }
 0x2b7   :  { %1012 = vmatprep.subr.mxu1 %v1180_v0  ;;  %1034 = vmatpush3.msra.mxu0 %v694_v8 }
 0x2b8   :  { %1013 = vmatpush3.msra.mxu1 %v593_v49  ;;  %1035 = vmatprep.subr.mxu0 %v1180_v0 }
 0x2b9   :  { %1014 = vmatprep.subr.mxu1 %v1180_v0  ;;  %1036 = vmatpush3.msra.mxu0 %v693_v9 }
 0x2ba   :  { %1015 = vmatpush3.msra.mxu1 %v592_v50  ;;  %1037 = vmatprep.subr.mxu0 %v1180_v0 }
 0x2bb   :  { %1016 = vmatprep.subr.mxu1 %v1180_v0  ;;  %1038 = vmatpush3.msra.mxu0 %v692_v10 }
 0x2bc   :  { %1017 = vmatpush3.msra.mxu1 %v591_v51  ;;  %1039 = vmatprep.subr.mxu0 %v1180_v0 }
 0x2bd   :  { %1040 = vmatpush3.msra.mxu0 %v691_v11 }
 0x2be   :  { %1041 = vmatprep.subr.mxu0 %v1180_v0 }
 0x2bf   :  { %1042 = vmatpush3.msra.mxu0 %v690_v12 }
 0x2c0   :  { %1043 = vmatprep.subr.mxu0 %v1180_v0 }
 0x2c1   :  { %1044 = vmatpush3.msra.mxu0 %v689_v13 }
 0x2c2   :  { %1045 = vmatprep.subr.mxu0 %v1180_v0 }
 0x2c3   :  { %1046 = vmatpush3.msra.mxu0 %v688_v14 }
 0x2c4   :  { %1047 = vmatprep.subr.mxu0 %v1180_v0 }
 0x2c5   :  { %1048 = vmatpush3.msra.mxu0 %v687_v15 }
 0x2c6   :  { %1049 = vmatprep.subr.mxu0 %v1180_v0 }
 0x2c7   :  { %1050 = vmatpush3.msra.mxu0 %v686_v16 }
 0x2c8   :  { %1051 = vmatprep.subr.mxu0 %v1180_v0  ;;  %v782_v0 = vlaneseq }
 0x2c9   :  { %1052 = vmatpush3.msra.mxu0 %v685_v17 }
 0x2ca   :  { %v783_v28 = vshrl.u32 %v782_v0, 7 }
 0x2cc   :  { %v784_v30 = vsub.s32 0, %v783_v28  ;;  %v789_v31 = vsub.s32 1, %v783_v28  ;;  %v795_v35 = vsub.s32 2, %v783_v28 }
 0x2ce   :  { %v785_v33 = vrot.slane %v781_v32, %v784_v30  ;;  %v790_v34 = vrot.slane %v781_v32, %v789_v31  ;;  %v796_v39 = vrot.slane %v781_v32, %v795_v35 }
 0x2d0   :  { %v786_v37 = vmul.f32 %v785_v33, %v115_v29 }
 0x359   :  { %v421_v52 = vpop.f32.mrf.mxu0 }
 0x35a   :  { %v499_v53 = vmul.f32 %v421_v52, %v421_v52 }
 0x35b   :  { %v947_v54 = vpop.f32.mrf.mxu0  ;;  %v495_v55 = vpop.f32.mrf.mxu1 }
 0x35c   :  { %v500_v56 = vsub.f32 %v499_v53, %v495_v55 }
 0x35d   :  { %v966_v57 = vpop.f32.mrf.mxu1 }
 0x35e   :  { %v501_v58 = vmul.f32 0.5, %v500_v56 }
 0x360   :  { %v502_v59 = vsel %vm112_vm1, %v501_v58, 0.0 }
 0x361   :  { %503 = vadd.xlane.f32.xlu0 %v502_v59 }
 0x369   :  { %v586_v61 = vpop.f32.mrf.mxu0 }
 0x36a   :  { %v587_v62 = vadd.f32 %v821_v60, %v586_v61 }
 0x36b   :  { %v985_v63 = vpop.f32.mrf.mxu0 }
 0x36c   :  { %v590_v1 = vmax.f32 %v587_v62, 0.0 }
 0x36e   :  { %1019 = vmatmul.mubr.f32.vlgmr.msra.gmra.mxu1 %v590_v1 }
 0x3ea   :  { %v504_v36 = vpop.xlane.xlu0 %503 }
 0x3eb   :  { %v791_v38 = vmul.f32 %v790_v34, %v504_v36 }
 0x3ed   :  { %v792_v41 = vadd.f32 %v791_v38, %v786_v37 }
 0x42e   :  { %v680_v19 = vpop.f32.mrf.mxu1 }
 0x42f   :  { %v681_v20 = vadd.f32 %v823_v18, %v680_v19 }
 0x430   :  { %v1020_v21 = vpop.f32.mrf.mxu1 }
 0x431   :  { %v684_v22 = vmax.f32 %v681_v20, 0.0 }
 0x433   :  { %1054 = vmatmul.mubr.f32.vlgmr.msra.gmra.mxu0 %v684_v22 }
 0x4f3   :  { %v774_v24 = vpop.f32.mrf.mxu0 }
 0x4f4   :  { %v775_v25 = vadd.f32 %v824_v23, %v774_v24 }
 0x4f5   :  { %v1055_v26 = vpop.f32.mrf.mxu0 }
 0x4f6   :  { %v778_v27 = vmax.f32 %v775_v25, 0.0 }
 0x4f8   :  { %779 = vadd.xlane.f32.xlu1 %v778_v27 }
 0x581   :  { %v780_v40 = vpop.xlane.xlu1 %779 }
 0x582   :  { %v797_v42 = vmul.f32 %v796_v39, %v780_v40 }
 0x584   :  { %v798_v44 = vadd.f32 %v797_v42, %v792_v41 }
 0x586   :  { %v806_v45 = vadd.f32 %v825_v43, %v798_v44 }
 0x588   :  { %808 = vst.msk [vmem:[%s1458_s14] sm:$0xff] %vm807_vm3, %v806_v45 }
 0x589   :  { %813 = vsyncpa [#allocation3], 1 }
 0x58a   :  { %814 = vsyncpa [#allocation5], 1 }
 0x58b   :  { %815 = vsyncpa [#allocation8], 1 }

</bundles_post_ra>
